<compile_context>
chip_gen: v5e
topology: v5e:2x2
jax: 0.10.0
libtpu: 0.0.40
codegen_flags: <defaults>
</compile_context>

<pallas_src>
import jax
import jax.numpy as jnp
from jax.experimental import pallas as pl
from jax.experimental.pallas import tpu as pltpu

HIDDEN = 128  # fc1/fc2 width (fixed by the module)


def map_actor_kernel(maxout_ref,          # SMEM (1, 1) f32
                     x_ref,               # VMEM (tile_b, d_in)  f32
                     w1_ref, b1_ref,      # VMEM (d_in, 128), (1, 128)
                     w2_ref, b2_ref,      # VMEM (128, 128),  (1, 128)
                     w3_ref, b3_ref,      # VMEM (128, d_out),(1, d_out)
                     o_ref):              # VMEM (tile_b, d_out) f32
    wdt = w1_ref.dtype                    # f32 or bf16 (f32 accumulation either way)

    # fc1 + relu
    h = jnp.dot(x_ref[...].astype(wdt), w1_ref[...],
                preferred_element_type=jnp.float32)
    h = jnp.maximum(h + b1_ref[...], 0.0)
    # fc2 + relu
    h = jnp.dot(h.astype(wdt), w2_ref[...], preferred_element_type=jnp.float32)
    h = jnp.maximum(h + b2_ref[...], 0.0)
    # fc3 + relu (kept so semantics hold even if maxoutput < 0)
    h = jnp.dot(h.astype(wdt), w3_ref[...], preferred_element_type=jnp.float32)
    h = jnp.maximum(h + b3_ref[...], 0.0)

    # Element-wise clamp exactly as the python loop:
    #   if x[i] > maxoutput -> maxoutput ; elif x[i] < 0.01 -> 0.01
    # (do NOT replace with jnp.clip: it diverges when maxoutput < 0.01)
    m = maxout_ref[0, 0]
    o_ref[...] = jnp.where(h > m, m, jnp.where(h < 0.01, 0.01, h))


def _round_up(n, m):
    return ((n + m - 1) // m) * m


def _choose_tile(batch, max_tile=1024):
    """Rows per grid tile: multiple of 8, <= max_tile, >= 2 tiles when possible."""
    if batch <= 8:
        return 8
    # 2-way split so v7x's two TensorCores both get a tile; cap at max_tile so
    # very large batches still use big 512-1024 row tiles that amortize the
    # per-grid-step pipeline overhead.
    half = _round_up(pl.cdiv(batch, 2), 8)
    return min(max_tile, half)


def pack_params(params, *, compute_dtype=jnp.float32):
    """One-time prep (call OUTSIDE the hot loop): dtype cast + bias reshape.

    params = (w1, b1, w2, b2, w3, b3) with w1:(d_in,128), w2:(128,128),
    w3:(128,d_out).  compute_dtype=jnp.bfloat16 enables the MXU bf16 fast path
    (f32 accumulation is kept inside the kernel).
    """
    w1, b1, w2, b2, w3, b3 = params
    d_in, h1 = w1.shape
    d_out = w3.shape[1]
    assert h1 == HIDDEN, f"fc1 must have {HIDDEN} outputs, got {h1}"
    assert w2.shape == (HIDDEN, HIDDEN), w2.shape
    assert w3.shape[0] == HIDDEN, w3.shape
    assert b1.shape == (HIDDEN,) and b2.shape == (HIDDEN,) and b3.shape == (d_out,)
    return (w1.astype(compute_dtype),
            jnp.asarray(b1, jnp.float32).reshape(1, HIDDEN),
            w2.astype(compute_dtype),
            jnp.asarray(b2, jnp.float32).reshape(1, HIDDEN),
            w3.astype(compute_dtype),
            jnp.asarray(b3, jnp.float32).reshape(1, d_out))


def map_actor_forward_batched(xb, packed_params, maxoutput, *, max_tile=1024):
    """xb: (B, d_in) -> (B, d_out) f32; each row is an independent actor input."""
    w1, b1, w2, b2, w3, b3 = packed_params
    d_in = w1.shape[0]
    d_out = w3.shape[1]
    B = xb.shape[0]
    assert xb.shape[1] == d_in, (xb.shape, d_in)

    if xb.dtype != jnp.float32:
        xb = xb.astype(jnp.float32)

    # Hot path (B % 8 == 0): no input pad at all.  Otherwise pad the handful
    # of missing sublane rows (tiny, only for ragged/small batches).
    Bp = _round_up(max(B, 8), 8)
    if Bp != B:
        xb = jnp.zeros((Bp, d_in), jnp.float32).at[:B].set(xb)

    tile_b = _choose_tile(Bp, max_tile)
    grid = (pl.cdiv(Bp, tile_b),)

    maxout = jnp.asarray(maxoutput, jnp.float32).reshape(1, 1)

    w_itemsize = jnp.dtype(w1.dtype).itemsize
    flops = 2 * Bp * (d_in * HIDDEN + HIDDEN * HIDDEN + HIDDEN * d_out)
    bytes_accessed = int(
        xb.size * 4
        + (w1.size + w2.size + w3.size) * w_itemsize
        + (b1.size + b2.size + b3.size) * 4
        + Bp * d_out * 4)

    out = pl.pallas_call(
        map_actor_kernel,
        out_shape=jax.ShapeDtypeStruct((Bp, d_out), jnp.float32),
        grid=grid,
        in_specs=[
            # maxoutput scalar in SMEM
            pl.BlockSpec((1, 1), lambda i: (0, 0),
                         memory_space=pltpu.MemorySpace.SMEM),
            # batch tile of inputs (partial last block handled by Pallas)
            pl.BlockSpec((tile_b, d_in), lambda i: (i, 0)),
            # resident weights/biases: constant index_map -> DMA'd once, reused
            pl.BlockSpec((d_in, HIDDEN), lambda i: (0, 0)),
            pl.BlockSpec((1, HIDDEN), lambda i: (0, 0)),
            pl.BlockSpec((HIDDEN, HIDDEN), lambda i: (0, 0)),
            pl.BlockSpec((1, HIDDEN), lambda i: (0, 0)),
            pl.BlockSpec((HIDDEN, d_out), lambda i: (0, 0)),
            pl.BlockSpec((1, d_out), lambda i: (0, 0)),
        ],
        out_specs=pl.BlockSpec((tile_b, d_out), lambda i: (i, 0)),
        compiler_params=pltpu.CompilerParams(
            dimension_semantics=("parallel",)),
        cost_estimate=pl.CostEstimate(flops=flops, transcendentals=0,
                                      bytes_accessed=bytes_accessed),
    )(maxout, xb, w1, b1, w2, b2, w3, b3)

    return out if Bp == B else out[:B]


def map_actor_forward(x, packed_params, maxoutput):
    """Single-vector API matching the PyTorch module: x (d_in,) -> (d_out,)."""
    return map_actor_forward_batched(x.reshape(1, -1), packed_params, maxoutput)[0]


def init_params(key, input_dim, output_dim):
    """Deterministic synthetic init (Kaiming-uniform-ish, like nn.Linear)."""
    ks = jax.random.split(key, 6)

    def linear(kw, kb, fan_in, fan_out):
        bound = 1.0 / jnp.sqrt(jnp.asarray(fan_in, jnp.float32))
        w = jax.random.uniform(kw, (fan_in, fan_out), jnp.float32, -bound, bound)
        b = jax.random.uniform(kb, (fan_out,), jnp.float32, -bound, bound)
        return w, b

    w1, b1 = linear(ks[0], ks[1], input_dim, HIDDEN)
    w2, b2 = linear(ks[2], ks[3], HIDDEN, HIDDEN)
    w3, b3 = linear(ks[4], ks[5], HIDDEN, output_dim)
    return (w1, b1, w2, b2, w3, b3)


if __name__ == "__main__":
    input_dim = 32
    output_dim = 8
    maxoutput = 0.5
    batch = 200   # exercises 2 grid tiles incl. a partial last block

    key = jax.random.PRNGKey(0)
    k_params, k_x = jax.random.split(key)
    params = init_params(k_params, input_dim, output_dim)
    xb = jax.random.normal(k_x, (batch, input_dim), jnp.float32)

    # Pure-JAX reference of the same semantics.
    w1, b1, w2, b2, w3, b3 = params

    def ref_forward(rows):
        h = jnp.maximum(rows @ w1 + b1, 0.0)
        h = jnp.maximum(h @ w2 + b2, 0.0)
        h = jnp.maximum(h @ w3 + b3, 0.0)
        return jnp.where(h > maxoutput, maxoutput, jnp.where(h < 0.01, 0.01, h))

    ref_b = ref_forward(xb)

    # f32 path (numerically matches the PyTorch module).
    packed_f32 = pack_params(params)                       # one-time prep
    yb = map_actor_forward_batched(xb, packed_f32, maxoutput)
    jax.block_until_ready(yb)
    assert yb.shape == (batch, output_dim)
    assert jnp.allclose(yb, ref_b, atol=2e-5), (yb[:2], ref_b[:2])

    # Single-vector path (module-equivalent interface).
    y1 = map_actor_forward(xb[0], packed_f32, maxoutput)
    jax.block_until_ready(y1)
    assert y1.shape == (output_dim,)
    assert jnp.allclose(y1, ref_b[0], atol=2e-5), (y1, ref_b[0])

    # Optional bf16-input / f32-accumulate fast path (v6e/v7x MXU).
    packed_bf16 = pack_params(params, compute_dtype=jnp.bfloat16)
    yb16 = map_actor_forward_batched(xb, packed_bf16, maxoutput)
    jax.block_until_ready(yb16)
    assert yb16.shape == (batch, output_dim)
    assert bool(jnp.all(jnp.isfinite(yb16)))
    assert jnp.allclose(yb16, ref_b, atol=3e-2), (yb16[:2], ref_b[:2])

    print("KERNEL_OK")
</pallas_src>

<mosaic_0001>
module attributes {stable_mosaic.version = 11 : i64} {
  func.func @map_actor_kernel(%arg0: i32, %arg1: memref<1x1xf32, #tpu.memory_space<smem>>, %arg2: memref<104x32xf32, #tpu.memory_space<vmem>>, %arg3: memref<32x128xf32, #tpu.memory_space<vmem>>, %arg4: memref<1x128xf32, #tpu.memory_space<vmem>>, %arg5: memref<128x128xf32, #tpu.memory_space<vmem>>, %arg6: memref<1x128xf32, #tpu.memory_space<vmem>>, %arg7: memref<128x8xf32, #tpu.memory_space<vmem>>, %arg8: memref<1x8xf32, #tpu.memory_space<vmem>>, %arg9: memref<104x8xf32, #tpu.memory_space<vmem>>) attributes {dimension_semantics = [#tpu.dimension_semantics<parallel>], iteration_bounds = array<i64: 2>, scalar_prefetch = 0 : i64, scratch_operands = 0 : i64, tpu.core_type = #tpu.core_type<tc>, window_params = [{transform_indices = @transform_0, window_bounds = array<i64: 1, 1>}, {transform_indices = @transform_1, window_bounds = array<i64: 104, 32>}, {pipeline_mode = #tpu.pipeline_mode<synchronous>, transform_indices = @transform_2, window_bounds = array<i64: 32, 128>}, {pipeline_mode = #tpu.pipeline_mode<synchronous>, transform_indices = @transform_3, window_bounds = array<i64: 1, 128>}, {pipeline_mode = #tpu.pipeline_mode<synchronous>, transform_indices = @transform_4, window_bounds = array<i64: 128, 128>}, {pipeline_mode = #tpu.pipeline_mode<synchronous>, transform_indices = @transform_5, window_bounds = array<i64: 1, 128>}, {pipeline_mode = #tpu.pipeline_mode<synchronous>, transform_indices = @transform_6, window_bounds = array<i64: 128, 8>}, {pipeline_mode = #tpu.pipeline_mode<synchronous>, transform_indices = @transform_7, window_bounds = array<i64: 1, 8>}, {transform_indices = @transform_8, window_bounds = array<i64: 104, 8>}]} {
    %c0 = arith.constant 0 : index
    %c0_0 = arith.constant 0 : index
    %0 = vector.load %arg2[%c0, %c0_0] : memref<104x32xf32, #tpu.memory_space<vmem>>, vector<104x32xf32>
    %c0_1 = arith.constant 0 : index
    %c0_2 = arith.constant 0 : index
    %1 = vector.load %arg3[%c0_1, %c0_2] : memref<32x128xf32, #tpu.memory_space<vmem>>, vector<32x128xf32>
    %cst = arith.constant dense<0.000000e+00> : vector<104x128xf32>
    %2 = tpu.matmul %0, %1, %cst {dimension_numbers = #tpu.dot_dimension_numbers<[1], [0], [0], [1], [0, 0, 1, 1], [], []>} : vector<104x32xf32>, vector<32x128xf32>, vector<104x128xf32> -> vector<104x128xf32>
    %c0_3 = arith.constant 0 : index
    %c0_4 = arith.constant 0 : index
    %3 = vector.load %arg4[%c0_3, %c0_4] : memref<1x128xf32, #tpu.memory_space<vmem>>, vector<1x128xf32>
    %4 = vector.broadcast %3 : vector<1x128xf32> to vector<104x128xf32>
    %5 = arith.addf %2, %4 : vector<104x128xf32>
    %cst_5 = arith.constant 0.000000e+00 : f32
    %6 = vector.broadcast %cst_5 : f32 to vector<104x128xf32>
    %7 = arith.maximumf %5, %6 : vector<104x128xf32>
    %c0_6 = arith.constant 0 : index
    %c0_7 = arith.constant 0 : index
    %8 = vector.load %arg5[%c0_6, %c0_7] : memref<128x128xf32, #tpu.memory_space<vmem>>, vector<128x128xf32>
    %cst_8 = arith.constant dense<0.000000e+00> : vector<104x128xf32>
    %9 = tpu.matmul %7, %8, %cst_8 {dimension_numbers = #tpu.dot_dimension_numbers<[1], [0], [0], [1], [0, 0, 1, 1], [], []>} : vector<104x128xf32>, vector<128x128xf32>, vector<104x128xf32> -> vector<104x128xf32>
    %c0_9 = arith.constant 0 : index
    %c0_10 = arith.constant 0 : index
    %10 = vector.load %arg6[%c0_9, %c0_10] : memref<1x128xf32, #tpu.memory_space<vmem>>, vector<1x128xf32>
    %11 = vector.broadcast %10 : vector<1x128xf32> to vector<104x128xf32>
    %12 = arith.addf %9, %11 : vector<104x128xf32>
    %cst_11 = arith.constant 0.000000e+00 : f32
    %13 = vector.broadcast %cst_11 : f32 to vector<104x128xf32>
    %14 = arith.maximumf %12, %13 : vector<104x128xf32>
    %c0_12 = arith.constant 0 : index
    %c0_13 = arith.constant 0 : index
    %15 = vector.load %arg7[%c0_12, %c0_13] : memref<128x8xf32, #tpu.memory_space<vmem>>, vector<128x8xf32>
    %cst_14 = arith.constant dense<0.000000e+00> : vector<104x8xf32>
    %16 = tpu.matmul %14, %15, %cst_14 {dimension_numbers = #tpu.dot_dimension_numbers<[1], [0], [0], [1], [0, 0, 1, 1], [], []>} : vector<104x128xf32>, vector<128x8xf32>, vector<104x8xf32> -> vector<104x8xf32>
    %c0_15 = arith.constant 0 : index
    %c0_16 = arith.constant 0 : index
    %17 = vector.load %arg8[%c0_15, %c0_16] : memref<1x8xf32, #tpu.memory_space<vmem>>, vector<1x8xf32>
    %18 = vector.broadcast %17 : vector<1x8xf32> to vector<104x8xf32>
    %19 = arith.addf %16, %18 : vector<104x8xf32>
    %cst_17 = arith.constant 0.000000e+00 : f32
    %20 = vector.broadcast %cst_17 : f32 to vector<104x8xf32>
    %21 = arith.maximumf %19, %20 : vector<104x8xf32>
    %c0_18 = arith.constant 0 : index
    %c0_19 = arith.constant 0 : index
    %22 = memref.load %arg1[%c0_18, %c0_19] : memref<1x1xf32, #tpu.memory_space<smem>>
    %23 = vector.broadcast %22 : f32 to vector<104x8xf32>
    %24 = arith.cmpf ogt, %21, %23 : vector<104x8xf32>
    %cst_20 = arith.constant 0.00999999977 : f32
    %25 = vector.broadcast %cst_20 : f32 to vector<104x8xf32>
    %26 = arith.cmpf olt, %21, %25 : vector<104x8xf32>
    %cst_21 = arith.constant 0.00999999977 : f32
    %27 = vector.broadcast %cst_21 : f32 to vector<104x8xf32>
    %28 = arith.select %26, %27, %21 : vector<104x8xi1>, vector<104x8xf32>
    %29 = vector.broadcast %22 : f32 to vector<104x8xf32>
    %30 = arith.select %24, %29, %28 : vector<104x8xi1>, vector<104x8xf32>
    %c0_22 = arith.constant 0 : index
    %c0_23 = arith.constant 0 : index
    %31 = vector.load %arg9[%c0_22, %c0_23] : memref<104x8xf32, #tpu.memory_space<vmem>>, vector<104x8xf32>
    tpu.vector_store %arg9[%c0_22, %c0_23], %30 {strides = array<i32>} : memref<104x8xf32, #tpu.memory_space<vmem>>, vector<104x8xf32>,
    return
  }
  func.func @transform_0(%arg0: i32) -> (i32, i32) {
    %c0_i32 = arith.constant 0 : i32
    %c0_i32_0 = arith.constant 0 : i32
    %c0_i32_1 = arith.constant 0 : i32
    return %c0_i32, %c0_i32_0 : i32, i32
  }
  func.func @transform_1(%arg0: i32) -> (i32, i32) {
    %c0_i32 = arith.constant 0 : i32
    %c0_i32_0 = arith.constant 0 : i32
    return %arg0, %c0_i32 : i32, i32
  }
  func.func @transform_2(%arg0: i32) -> (i32, i32) {
    %c0_i32 = arith.constant 0 : i32
    %c0_i32_0 = arith.constant 0 : i32
    %c0_i32_1 = arith.constant 0 : i32
    return %c0_i32, %c0_i32_0 : i32, i32
  }
  func.func @transform_3(%arg0: i32) -> (i32, i32) {
    %c0_i32 = arith.constant 0 : i32
    %c0_i32_0 = arith.constant 0 : i32
    %c0_i32_1 = arith.constant 0 : i32
    return %c0_i32, %c0_i32_0 : i32, i32
  }
  func.func @transform_4(%arg0: i32) -> (i32, i32) {
    %c0_i32 = arith.constant 0 : i32
    %c0_i32_0 = arith.constant 0 : i32
    %c0_i32_1 = arith.constant 0 : i32
    return %c0_i32, %c0_i32_0 : i32, i32
  }
  func.func @transform_5(%arg0: i32) -> (i32, i32) {
    %c0_i32 = arith.constant 0 : i32
    %c0_i32_0 = arith.constant 0 : i32
    %c0_i32_1 = arith.constant 0 : i32
    return %c0_i32, %c0_i32_0 : i32, i32
  }
  func.func @transform_6(%arg0: i32) -> (i32, i32) {
    %c0_i32 = arith.constant 0 : i32
    %c0_i32_0 = arith.constant 0 : i32
    %c0_i32_1 = arith.constant 0 : i32
    return %c0_i32, %c0_i32_0 : i32, i32
  }
  func.func @transform_7(%arg0: i32) -> (i32, i32) {
    %c0_i32 = arith.constant 0 : i32
    %c0_i32_0 = arith.constant 0 : i32
    %c0_i32_1 = arith.constant 0 : i32
    return %c0_i32, %c0_i32_0 : i32, i32
  }
  func.func @transform_8(%arg0: i32) -> (i32, i32) {
    %c0_i32 = arith.constant 0 : i32
    %c0_i32_0 = arith.constant 0 : i32
    return %arg0, %c0_i32 : i32, i32
  }
}

</mosaic_0001>

<bundles_post_ra>
// kernel: tpu_custom_call.1
= control target key start
LH: loop header
LB: loop body
LE: loop exit
PB: predicated region body
PF: predicated region fallthrough
CT: control target
= control target key end

     0   :  { %s1630_s0 = inlined_call_operand.<no memory space> [shape: f32[1,1], index: 0, kind: input, shape index: {}]   ;;  %s1631_s1 = inlined_call_operand.vmem [shape: f32[200,32], index: 1, kind: input, shape index: {}]   ;;  %s1632_s2 = inlined_call_operand.vmem [shape: f32[32,128], index: 2, kind: input, shape index: {}]   ;;  %s1633_s3 = inlined_call_operand.vmem [shape: f32[1,128], index: 3, kind: input, shape index: {}]   ;;  %s1634_s4 = inlined_call_operand.vmem [shape: f32[128,128], index: 4, kind: input, shape index: {}]   ;;  %s1635_s5 = inlined_call_operand.vmem [shape: f32[1,128], index: 5, kind: input, shape index: {}]   ;;  %s1636_s6 = inlined_call_operand.vmem [shape: f32[128,8], index: 6, kind: input, shape index: {}]   ;;  %s1637_s7 = inlined_call_operand.vmem [shape: f32[1,8], index: 7, kind: input, shape index: {}]   ;;  %s1638_s8 = inlined_call_operand.vmem [shape: f32[200,8], index: 8, kind: output, shape index: {}]  }
   0x1   :  { %13 = sst [smem:[#allocation2]] %s1630_s0 }
   0x2   :  { %s1268_s29 = smov 0   ;;  %s1270_s30 = smov 0  }
   0x3   :  { %s1272_s9 = smov 0  }
   0x4 LB: > { %s1281_s0 = sadd.s32 4294967295, %s1186_s9   ;;  %s1283_s10 = sadd.s32 1, %s1186_s9   ;;  %s1186_s9 = sphi %s1272_s9, %s1647_s9   ;;  %s1182_s30 = sphi %s1270_s30, %s1646_s30   ;;  %s1178_s29 = sphi %s1268_s29, %s1645_s29  }
   0x5   : > { %s196_s11 = ssub.s32 %s1186_s9, %s1283_s10  ;;  %s199_s12 = sadd.s32 1, %s1182_s30 }
   0x6   : > { %p197_p0 = scmp.eq.s32.totalorder %s196_s11, 0  ;;  %p209_p1 = scmp.ne.s32.totalorder %s1182_s30, %s1178_s29 }
   0x7   : > { %p210_p2 = scmp.eq.s32.totalorder %s1281_s0, 1  ;;  %p973_p3 = scmp.ge.s32.totalorder %s1186_s9, 1 }
   0x8   : > { %s1291_s13 = scalar_select %p197_p0, %s1182_s30, %s199_s12  }
   0x9   : > { %p1293_p4 = por %p210_p2, %p209_p1  ;;  %p272_p5 = scmp.lt.s32.totalorder %s1186_s9, 3 }
   0xb   : > { %p273_p6 = pnand %p973_p3, %p272_p5 }
   0xc   : > { %s1304_s19 = smul.u32 (!%p273_p6), 13, %s1281_s0  ;;  %s636_s17 = sld [smem:[#allocation2]] (!%p273_p6) }
   0xd   : > { %276 = sbr.rel (%p273_p6) target bundleno = 588 (0x24c), region = 52  ;;  %s306_s21 = sand.u32 (!%p273_p6), 1, %s1178_s29  }
   0xe   : > { %p314_p7 = scmp.lt.s32.totalorder (!%p273_p6), %s1304_s19, 24  ;;  %s1033_s22 = smul.u32 (!%p273_p6), 104, %s306_s21 }
  0x10   : > { %s1473_s23 = scalar_lea.vmem (!%p273_p6), [#allocation3], %s1033_s22  }
  0x12   : > { %v344_v0 = vld [vmem:[%s1632_s2 + $0x18] sm:$0xff]  ;;  %v343_v1 = vld [vmem:[%s1632_s2 + $0x10] sm:$0xff]  ;;  %v342_v2 = vld [vmem:[%s1632_s2 + $0x8] sm:$0xff]  ;;  %s315_s24 = scalar_select %p314_p7, %s1304_s19, 24  ;;  %vm349_vm0 = vcmask 261120   ;;  %vm690_vm3 = vcmask 64512  }
  0x13   : > { %401 = vmatpush.msra.mxu0 %v344_v0  ;;  %v341_v3 = vld [vmem:[%s1632_s2] sm:$0xff]  ;;  %v473_v13 = vld [vmem:[%s1634_s4 + $0x78] sm:$0xff]  ;;  %v472_v14 = vld [vmem:[%s1634_s4 + $0x70] sm:$0xff]  ;;  %s712_s29 = ssub.s32 (%p1293_p4), 25, %s1304_s19 }
  0x14   : > { %s974_s25 = sshll.u32 %s315_s24, 3  ;;  %478 = vmatpush.msra.mxu1 %v473_v13  ;;  %1001 = vmatpush.msra.mxu3 %v473_v13  ;;  %v471_v15 = vld [vmem:[%s1634_s4 + $0x68] sm:$0xff]  ;;  %v470_v16 = vld [vmem:[%s1634_s4 + $0x60] sm:$0xff]  ;;  %v469_v18 = vld [vmem:[%s1634_s4 + $0x58] sm:$0xff]  ;;  %s1000_s24 = smul.u32 (%p1293_p4), 104, %s1281_s0 }
  0x15   : > { %402 = vmatpush.msra.mxu0 %v343_v1  ;;  %s1317_s28 = scalar_lea.vmem %s1631_s1, %s974_s25  ;;  %v468_v19 = vld [vmem:[%s1634_s4 + $0x50] sm:$0xff]  ;;  %v467_v20 = vld [vmem:[%s1634_s4 + $0x48] sm:$0xff]  ;;  %v466_v21 = vld [vmem:[%s1634_s4 + $0x40] sm:$0xff]  ;;  %p713_p8 = scmp.lt.s32.totalorder (%p1293_p4), %s712_s29, 13 }
  0x16   : > { %v328_v4 = vld [vmem:[%s1317_s28] sm:$0xff]  ;;  %v329_v5 = vld [vmem:[%s1317_s28 + $0x8] sm:$0xff]  ;;  %v330_v6 = vld [vmem:[%s1317_s28 + $0x10] sm:$0xff]  ;;  %479 = vmatpush.msra.mxu1 %v472_v14  ;;  %1002 = vmatpush.msra.mxu3 %v472_v14  ;;  %s1544_s27 = scalar_lea.vmem (%p1293_p4), %s1638_s8, %s1000_s24  }
  0x17   : > { %403 = vmatpush.msra.mxu0 %v342_v2  ;;  %v331_v7 = vld [vmem:[%s1317_s28 + $0x18] sm:$0xff]  ;;  %v332_v8 = vld [vmem:[%s1317_s28 + $0x20] sm:$0xff]  ;;  %v333_v9 = vld [vmem:[%s1317_s28 + $0x28] sm:$0xff] }
  0x18   : > { %v334_v10 = vld [vmem:[%s1317_s28 + $0x30] sm:$0xff]  ;;  %v335_v11 = vld [vmem:[%s1317_s28 + $0x38] sm:$0xff]  ;;  %v336_v12 = vld [vmem:[%s1317_s28 + $0x40] sm:$0xff]  ;;  %480 = vmatpush.msra.mxu1 %v471_v15  ;;  %1003 = vmatpush.msra.mxu3 %v471_v15 }
  0x19   : > { %404 = vmatpush.msra.mxu0 %v341_v3  ;;  %v337_v17 = vld [vmem:[%s1317_s28 + $0x48] sm:$0xff]  ;;  %v338_v22 = vld [vmem:[%s1317_s28 + $0x50] sm:$0xff]  ;;  %v465_v23 = vld [vmem:[%s1634_s4 + $0x38] sm:$0xff] }
  0x1a   : > { %975 = vmatmul.msk.f32.vlgmr.msra.gmra.mxu0 %vm349_vm0, %v328_v4  ;;  %481 = vmatpush.msra.mxu1 %v470_v16  ;;  %v464_v24 = vld [vmem:[%s1634_s4 + $0x30] sm:$0xff]  ;;  %v463_v25 = vld [vmem:[%s1634_s4 + $0x28] sm:$0xff]  ;;  %v462_v26 = vld [vmem:[%s1634_s4 + $0x20] sm:$0xff] }
  0x1b   : > { %1004 = vmatpush.msra.mxu3 %v470_v16  ;;  %v339_v27 = vld [vmem:[%s1317_s28 + $0x58] sm:$0xff]  ;;  %v460_v29 = vld [vmem:[%s1634_s4 + $0x10] sm:$0xff]  ;;  %v340_v30 = vld [vmem:[%s1317_s28 + $0x60] sm:$0xff] }
  0x1c   : > { %482 = vmatpush.msra.mxu1 %v469_v18  ;;  %v461_v28 = vld [vmem:[%s1634_s4 + $0x18] sm:$0xff]  ;;  %v459_v31 = vld [vmem:[%s1634_s4 + $0x8] sm:$0xff]  ;;  %v458_v32 = vld [vmem:[%s1634_s4] sm:$0xff] }
  0x1d   : > { %1005 = vmatpush.msra.mxu3 %v469_v18  ;;  %v1396_v33 = vld [vmem:[%s1633_s3] ss:$0 sm:$0xff]  ;;  %v562_v61 = vld [vmem:[%s1636_s6 + $0x78] sm:$0xff]  ;;  %v561_v62 = vld [vmem:[%s1636_s6 + $0x70] sm:$0xff] }
  0x1e   : > { %483 = vmatpush.msra.mxu1 %v468_v19  ;;  %567 = vmatpush.msra.mxu2 %v562_v61  ;;  %v560_v63 = vld [vmem:[%s1636_s6 + $0x68] sm:$0xff]  ;;  %v559_v2 = vld [vmem:[%s1636_s6 + $0x60] sm:$0xff]  ;;  %v558_v4 = vld [vmem:[%s1636_s6 + $0x58] sm:$0xff] }
  0x1f   : > { %1006 = vmatpush.msra.mxu3 %v468_v19  ;;  %v552_v13 = vld [vmem:[%s1636_s6 + $0x28] sm:$0xff]  ;;  %v551_v16 = vld [vmem:[%s1636_s6 + $0x20] sm:$0xff]  ;;  %v550_v18 = vld [vmem:[%s1636_s6 + $0x18] sm:$0xff] }
  0x20   : > { %484 = vmatpush.msra.mxu1 %v467_v20  ;;  %568 = vmatpush.msra.mxu2 %v561_v62 }
  0x21   : > { %1007 = vmatpush.msra.mxu3 %v467_v20 }
  0x22   : > { %976 = vmatmul.msk.f32.gmra.mxu0 %vm349_vm0, %v329_v5  ;;  %485 = vmatpush.msra.mxu1 %v466_v21  ;;  %v557_v5 = vld [vmem:[%s1636_s6 + $0x50] sm:$0xff] }
  0x23   : > { %1008 = vmatpush.msra.mxu3 %v466_v21  ;;  %569 = vmatpush.msra.mxu2 %v560_v63  ;;  %v549_v21 = vld [vmem:[%s1636_s6 + $0x10] sm:$0xff] }
  0x24   : > { %486 = vmatpush.msra.mxu1 %v465_v23 }
  0x25   : > { %1009 = vmatpush.msra.mxu3 %v465_v23  ;;  %570 = vmatpush.msra.mxu2 %v559_v2  ;;  %v548_v23 = vld [vmem:[%s1636_s6 + $0x8] sm:$0xff] }
  0x26   : > { %487 = vmatpush.msra.mxu1 %v464_v24 }
  0x27   : > { %1010 = vmatpush.msra.mxu3 %v464_v24  ;;  %571 = vmatpush.msra.mxu2 %v558_v4  ;;  %v547_v24 = vld [vmem:[%s1636_s6] sm:$0xff] }
  0x28   : > { %488 = vmatpush.msra.mxu1 %v463_v25 }
  0x29   : > { %1011 = vmatpush.msra.mxu3 %v463_v25  ;;  %572 = vmatpush.msra.mxu2 %v557_v5  ;;  %v1124_v25 = vld [vmem:[%s1635_s5] ss:$0 sm:$0xff] }
  0x2a   : > { %977 = vmatmul.msk.f32.gmra.mxu0 %vm349_vm0, %v330_v6  ;;  %489 = vmatpush.msra.mxu1 %v462_v26  ;;  %v556_v6 = vld [vmem:[%s1636_s6 + $0x48] sm:$0xff] }
  0x2b   : > { %1012 = vmatpush.msra.mxu3 %v462_v26  ;;  %573 = vmatpush.msra.mxu2 %v556_v6 }
  0x2c   : > { %490 = vmatpush.msra.mxu1 %v461_v28 }
  0x2d   : > { %1013 = vmatpush.msra.mxu3 %v461_v28 }
  0x2e   : > { %491 = vmatpush.msra.mxu1 %v460_v29 }
  0x2f   : > { %1014 = vmatpush.msra.mxu3 %v460_v29 }
  0x30   : > { %492 = vmatpush.msra.mxu1 %v459_v31 }
  0x31   : > { %1015 = vmatpush.msra.mxu3 %v459_v31 }
  0x32   : > { %978 = vmatmul.msk.f32.gmra.mxu0 %vm349_vm0, %v331_v7  ;;  %493 = vmatpush.msra.mxu1 %v458_v32 }
  0x33   : > { %1016 = vmatpush.msra.mxu3 %v458_v32 }
  0x35   : > { %1017 = vmatpush.msrb.mxu3 %v562_v61 }
  0x37   : > { %1018 = vmatpush.msrb.mxu3 %v561_v62 }
  0x39   : > { %1019 = vmatpush.msrb.mxu3 %v560_v63 }
  0x3a   : > { %979 = vmatmul.msk.f32.gmra.mxu0 %vm349_vm0, %v332_v8 }
  0x3b   : > { %1020 = vmatpush.msrb.mxu3 %v559_v2 }
  0x3d   : > { %1021 = vmatpush.msrb.mxu3 %v558_v4  ;;  %v1469_v4 = vstv %s636_s17 }
  0x3f   : > { %1022 = vmatpush.msrb.mxu3 %v557_v5 }
  0x41   : > { %1023 = vmatpush.msrb.mxu3 %v556_v6 }
  0x42   : > { %980 = vmatmul.msk.f32.gmra.mxu0 %vm349_vm0, %v333_v9  ;;  %v555_v9 = vld [vmem:[%s1636_s6 + $0x40] sm:$0xff] }
  0x43   : > { %574 = vmatpush.msra.mxu2 %v555_v9  ;;  %1024 = vmatpush.msrb.mxu3 %v555_v9 }
  0x4a   : > { %981 = vmatmul.msk.f32.gmra.mxu0 %vm349_vm0, %v334_v10 }
  0x52   : > { %982 = vmatmul.msk.f32.gmra.mxu0 %vm349_vm0, %v335_v11  ;;  %v554_v11 = vld [vmem:[%s1636_s6 + $0x38] sm:$0xff] }
  0x53   : > { %575 = vmatpush.msra.mxu2 %v554_v11  ;;  %1025 = vmatpush.msrb.mxu3 %v554_v11 }
  0x5a   : > { %983 = vmatmul.msk.f32.gmra.mxu0 %vm349_vm0, %v336_v12  ;;  %v553_v12 = vld [vmem:[%s1636_s6 + $0x30] sm:$0xff] }
  0x5b   : > { %576 = vmatpush.msra.mxu2 %v553_v12  ;;  %1026 = vmatpush.msrb.mxu3 %v553_v12 }
  0x5d   : > { %577 = vmatpush.msra.mxu2 %v552_v13  ;;  %1027 = vmatpush.msrb.mxu3 %v552_v13 }
  0x5f   : > { %578 = vmatpush.msra.mxu2 %v551_v16  ;;  %1028 = vmatpush.msrb.mxu3 %v551_v16 }
  0x61   : > { %579 = vmatpush.msra.mxu2 %v550_v18  ;;  %1029 = vmatpush.msrb.mxu3 %v550_v18 }
  0x62   : > { %984 = vmatmul.msk.f32.gmra.mxu0 %vm349_vm0, %v337_v17 }
  0x63   : > { %580 = vmatpush.msra.mxu2 %v549_v21  ;;  %1030 = vmatpush.msrb.mxu3 %v549_v21 }
  0x65   : > { %581 = vmatpush.msra.mxu2 %v548_v23  ;;  %1031 = vmatpush.msrb.mxu3 %v548_v23 }
  0x67   : > { %582 = vmatpush.msra.mxu2 %v547_v24  ;;  %1032 = vmatpush.msrb.mxu3 %v547_v24 }
  0x6a   : > { %985 = vmatmul.msk.f32.gmra.mxu0 %vm349_vm0, %v338_v22 }
  0x72   : > { %986 = vmatmul.msk.f32.gmra.mxu0 %vm349_vm0, %v339_v27 }
  0x7a   : > { %987 = vmatmul.msk.f32.gmra.mxu0 %vm349_vm0, %v340_v30 }
  0x97   : > { %v406_v34 = vpop.f32.mrf.mxu0 }
  0x98   : > { %v407_v35 = vadd.f32 %v1396_v33, %v406_v34 }
  0x9a   : > { %v445_v36 = vmax.f32 %v407_v35, 0.0 }
  0x9c   : > { %494 = vmatmul.f32.vlgmr.msra.gmra.mxu1 %v445_v36 }
  0x9f   : > { %v409_v37 = vpop.f32.mrf.mxu0 }
  0xa0   : > { %v410_v38 = vadd.f32 %v1396_v33, %v409_v37 }
  0xa2   : > { %v446_v39 = vmax.f32 %v410_v38, 0.0 }
  0xa4   : > { %497 = vmatmul.f32.gmra.mxu1 %v446_v39 }
  0xa7   : > { %v412_v40 = vpop.f32.mrf.mxu0 }
  0xa8   : > { %v413_v41 = vadd.f32 %v1396_v33, %v412_v40 }
  0xaa   : > { %v447_v42 = vmax.f32 %v413_v41, 0.0 }
  0xac   : > { %500 = vmatmul.f32.gmra.mxu1 %v447_v42 }
  0xaf   : > { %v415_v43 = vpop.f32.mrf.mxu0 }
  0xb0   : > { %v416_v44 = vadd.f32 %v1396_v33, %v415_v43 }
  0xb2   : > { %v448_v45 = vmax.f32 %v416_v44, 0.0 }
  0xb4   : > { %503 = vmatmul.f32.gmra.mxu1 %v448_v45 }
  0xb7   : > { %v418_v46 = vpop.f32.mrf.mxu0 }
  0xb8   : > { %v419_v47 = vadd.f32 %v1396_v33, %v418_v46 }
  0xba   : > { %v449_v48 = vmax.f32 %v419_v47, 0.0 }
  0xbc   : > { %506 = vmatmul.f32.gmra.mxu1 %v449_v48 }
  0xbf   : > { %v421_v49 = vpop.f32.mrf.mxu0 }
  0xc0   : > { %v422_v50 = vadd.f32 %v1396_v33, %v421_v49 }
  0xc2   : > { %v450_v51 = vmax.f32 %v422_v50, 0.0 }
  0xc4   : > { %509 = vmatmul.f32.gmra.mxu1 %v450_v51 }
  0xc7   : > { %v424_v52 = vpop.f32.mrf.mxu0 }
  0xc8   : > { %v425_v53 = vadd.f32 %v1396_v33, %v424_v52 }
  0xca   : > { %v451_v54 = vmax.f32 %v425_v53, 0.0 }
  0xcc   : > { %512 = vmatmul.f32.gmra.mxu1 %v451_v54 }
  0xcf   : > { %v427_v55 = vpop.f32.mrf.mxu0 }
  0xd0   : > { %v428_v56 = vadd.f32 %v1396_v33, %v427_v55 }
  0xd2   : > { %v452_v57 = vmax.f32 %v428_v56, 0.0 }
  0xd4   : > { %515 = vmatmul.f32.gmra.mxu1 %v452_v57 }
  0xd7   : > { %v430_v58 = vpop.f32.mrf.mxu0 }
  0xd8   : > { %v431_v59 = vadd.f32 %v1396_v33, %v430_v58 }
  0xda   : > { %v453_v60 = vmax.f32 %v431_v59, 0.0 }
  0xdc   : > { %518 = vmatmul.f32.gmra.mxu1 %v453_v60 }
  0xdf   : > { %v433_v0 = vpop.f32.mrf.mxu0 }
  0xe0   : > { %v434_v1 = vadd.f32 %v1396_v33, %v433_v0 }
  0xe2   : > { %v454_v3 = vmax.f32 %v434_v1, 0.0  ;;  %v1465_v1 = vld [vmem:[%s1637_s7] ss:$0 sm:$0xff] }
  0xe4   : > { %521 = vmatmul.f32.vlgmr.msra.gmra.mxu3 %v454_v3 }
  0xe7   : > { %v436_v7 = vpop.f32.mrf.mxu0 }
  0xe8   : > { %v437_v8 = vadd.f32 %v1396_v33, %v436_v7 }
  0xea   : > { %v455_v10 = vmax.f32 %v437_v8, 0.0 }
  0xec   : > { %524 = vmatmul.f32.gmra.mxu3 %v455_v10 }
  0xef   : > { %v439_v14 = vpop.f32.mrf.mxu0 }
  0xf0   : > { %v440_v15 = vadd.f32 %v1396_v33, %v439_v14 }
  0xf2   : > { %v456_v17 = vmax.f32 %v440_v15, 0.0 }
  0xf4   : > { %527 = vmatmul.f32.gmra.mxu3 %v456_v17 }
  0xf7   : > { %v442_v19 = vpop.f32.mrf.mxu0 }
  0xf8   : > { %v443_v20 = vadd.f32 %v1396_v33, %v442_v19 }
  0xfa   : > { %v457_v22 = vmax.f32 %v443_v20, 0.0 }
  0xfc   : > { %530 = vmatmul.f32.gmra.mxu3 %v457_v22 }
 0x119   : > { %v495_v26 = vpop.f32.mrf.mxu1 }
 0x11a   : > { %v496_v27 = vadd.f32 %v1124_v25, %v495_v26 }
 0x11c   : > { %v534_v28 = vmax.f32 %v496_v27, 0.0 }
 0x11e   : > { %583 = vmatmul.f32.vlgmr.msra.gmra.mxu2 %v534_v28 }
 0x121   : > { %v498_v29 = vpop.f32.mrf.mxu1 }
 0x122   : > { %v499_v30 = vadd.f32 %v1124_v25, %v498_v29 }
 0x124   : > { %v535_v31 = vmax.f32 %v499_v30, 0.0 }
 0x126   : > { %586 = vmatmul.f32.gmra.mxu2 %v535_v31 }
 0x129   : > { %v501_v32 = vpop.f32.mrf.mxu1 }
 0x12a   : > { %v502_v33 = vadd.f32 %v1124_v25, %v501_v32 }
 0x12c   : > { %v536_v34 = vmax.f32 %v502_v33, 0.0 }
 0x12e   : > { %589 = vmatmul.f32.gmra.mxu2 %v536_v34 }
 0x131   : > { %v504_v35 = vpop.f32.mrf.mxu1 }
 0x132   : > { %v505_v36 = vadd.f32 %v1124_v25, %v504_v35 }
 0x134   : > { %v537_v37 = vmax.f32 %v505_v36, 0.0 }
 0x136   : > { %592 = vmatmul.f32.gmra.mxu2 %v537_v37 }
 0x139   : > { %v507_v38 = vpop.f32.mrf.mxu1 }
 0x13a   : > { %v508_v39 = vadd.f32 %v1124_v25, %v507_v38 }
 0x13c   : > { %v538_v40 = vmax.f32 %v508_v39, 0.0 }
 0x13e   : > { %595 = vmatmul.f32.gmra.mxu2 %v538_v40 }
 0x141   : > { %v510_v41 = vpop.f32.mrf.mxu1 }
 0x142   : > { %v511_v42 = vadd.f32 %v1124_v25, %v510_v41 }
 0x144   : > { %v539_v43 = vmax.f32 %v511_v42, 0.0 }
 0x146   : > { %598 = vmatmul.f32.gmra.mxu2 %v539_v43 }
 0x149   : > { %v513_v44 = vpop.f32.mrf.mxu1 }
 0x14a   : > { %v514_v45 = vadd.f32 %v1124_v25, %v513_v44 }
 0x14c   : > { %v540_v46 = vmax.f32 %v514_v45, 0.0 }
 0x14e   : > { %601 = vmatmul.f32.gmra.mxu2 %v540_v46 }
 0x151   : > { %v516_v47 = vpop.f32.mrf.mxu1 }
 0x152   : > { %v517_v48 = vadd.f32 %v1124_v25, %v516_v47 }
 0x154   : > { %v541_v49 = vmax.f32 %v517_v48, 0.0 }
 0x156   : > { %604 = vmatmul.f32.gmra.mxu2 %v541_v49 }
 0x159   : > { %v519_v50 = vpop.f32.mrf.mxu1 }
 0x15a   : > { %v520_v51 = vadd.f32 %v1124_v25, %v519_v50 }
 0x15c   : > { %v542_v52 = vmax.f32 %v520_v51, 0.0 }
 0x15e   : > { %607 = vmatmul.f32.gmra.mxu2 %v542_v52 }
 0x167   : > { %v522_v53 = vpop.f32.mrf.mxu3 }
 0x168   : > { %v523_v54 = vadd.f32 %v1124_v25, %v522_v53 }
 0x16a   : > { %v543_v55 = vmax.f32 %v523_v54, 0.0 }
 0x16c   : > { %610 = vmatmul.f32.vlgmr.msrb.gmra.mxu3 %v543_v55 }
 0x16f   : > { %v525_v56 = vpop.f32.mrf.mxu3 }
 0x170   : > { %v526_v57 = vadd.f32 %v1124_v25, %v525_v56 }
 0x172   : > { %v544_v58 = vmax.f32 %v526_v57, 0.0 }
 0x174   : > { %613 = vmatmul.f32.gmra.mxu3 %v544_v58 }
 0x177   : > { %v528_v59 = vpop.f32.mrf.mxu3 }
 0x178   : > { %v529_v60 = vadd.f32 %v1124_v25, %v528_v59 }
 0x17a   : > { %v545_v61 = vmax.f32 %v529_v60, 0.0 }
 0x17c   : > { %616 = vmatmul.f32.gmra.mxu3 %v545_v61 }
 0x17f   : > { %v531_v62 = vpop.f32.mrf.mxu3 }
 0x180   : > { %v532_v63 = vadd.f32 %v1124_v25, %v531_v62 }
 0x182   : > { %v546_v0 = vmax.f32 %v532_v63, 0.0 }
 0x184   : > { %619 = vmatmul.f32.gmra.mxu3 %v546_v0 }
 0x1a1   : > { %v584_v2 = vpop.f32.mrf.mxu2 }
 0x1a2   : > { %v585_v3 = vadd.f32 %v1465_v1, %v584_v2 }
 0x1a4   : > { %v623_v5 = vmax.f32 %v585_v3, 0.0 }
 0x1a6   : > { %vm638_vm1 = vcmp.gt.f32.partialorder %v623_v5, %v1469_v4  ;;  %vm651_vm2 = vcmp.lt.f32.partialorder %v623_v5, 0.01 }
 0x1a7   : > { %v664_v6 = vsel %vm651_vm2, 0.01, %v623_v5 }
 0x1a8   : > { %v677_v7 = vsel %vm638_vm1, %v1469_v4, %v664_v6 }
 0x1a9   : > { %691 = vst.msk [vmem:[%s1473_s23] sm:$0xff] %vm690_vm3, %v677_v7  ;;  %v587_v8 = vpop.f32.mrf.mxu2 }
 0x1aa   : > { %v588_v9 = vadd.f32 %v1465_v1, %v587_v8 }
 0x1ac   : > { %v624_v10 = vmax.f32 %v588_v9, 0.0 }
 0x1ae   : > { %vm639_vm4 = vcmp.gt.f32.partialorder %v624_v10, %v1469_v4  ;;  %vm652_vm5 = vcmp.lt.f32.partialorder %v624_v10, 0.01 }
 0x1af   : > { %v665_v11 = vsel %vm652_vm5, 0.01, %v624_v10 }
 0x1b0   : > { %v678_v12 = vsel %vm639_vm4, %v1469_v4, %v665_v11 }
 0x1b1   : > { %692 = vst.msk [vmem:[%s1473_s23 + $0x8] sm:$0xff] %vm690_vm3, %v678_v12  ;;  %v590_v13 = vpop.f32.mrf.mxu2 }
 0x1b2   : > { %v591_v14 = vadd.f32 %v1465_v1, %v590_v13 }
 0x1b4   : > { %v625_v15 = vmax.f32 %v591_v14, 0.0 }
 0x1b6   : > { %vm640_vm6 = vcmp.gt.f32.partialorder %v625_v15, %v1469_v4  ;;  %vm653_vm7 = vcmp.lt.f32.partialorder %v625_v15, 0.01 }
 0x1b7   : > { %v666_v16 = vsel %vm653_vm7, 0.01, %v625_v15 }
 0x1b8   : > { %v679_v17 = vsel %vm640_vm6, %v1469_v4, %v666_v16 }
 0x1b9   : > { %693 = vst.msk [vmem:[%s1473_s23 + $0x10] sm:$0xff] %vm690_vm3, %v679_v17  ;;  %v593_v18 = vpop.f32.mrf.mxu2 }
 0x1ba   : > { %v594_v19 = vadd.f32 %v1465_v1, %v593_v18 }
 0x1bc   : > { %v626_v20 = vmax.f32 %v594_v19, 0.0 }
 0x1be   : > { %vm641_vm8 = vcmp.gt.f32.partialorder %v626_v20, %v1469_v4  ;;  %vm654_vm9 = vcmp.lt.f32.partialorder %v626_v20, 0.01 }
 0x1bf   : > { %v667_v21 = vsel %vm654_vm9, 0.01, %v626_v20 }
 0x1c0   : > { %v680_v22 = vsel %vm641_vm8, %v1469_v4, %v667_v21 }
 0x1c1   : > { %694 = vst.msk [vmem:[%s1473_s23 + $0x18] sm:$0xff] %vm690_vm3, %v680_v22  ;;  %v596_v23 = vpop.f32.mrf.mxu2 }
 0x1c2   : > { %v597_v24 = vadd.f32 %v1465_v1, %v596_v23 }
 0x1c4   : > { %v627_v25 = vmax.f32 %v597_v24, 0.0 }
 0x1c6   : > { %vm642_vm10 = vcmp.gt.f32.partialorder %v627_v25, %v1469_v4  ;;  %vm655_vm11 = vcmp.lt.f32.partialorder %v627_v25, 0.01 }
 0x1c7   : > { %v668_v26 = vsel %vm655_vm11, 0.01, %v627_v25 }
 0x1c8   : > { %v681_v27 = vsel %vm642_vm10, %v1469_v4, %v668_v26 }
 0x1c9   : > { %695 = vst.msk [vmem:[%s1473_s23 + $0x20] sm:$0xff] %vm690_vm3, %v681_v27  ;;  %v599_v28 = vpop.f32.mrf.mxu2 }
 0x1ca   : > { %v600_v29 = vadd.f32 %v1465_v1, %v599_v28 }
 0x1cc   : > { %v628_v30 = vmax.f32 %v600_v29, 0.0 }
 0x1ce   : > { %vm643_vm12 = vcmp.gt.f32.partialorder %v628_v30, %v1469_v4  ;;  %vm656_vm13 = vcmp.lt.f32.partialorder %v628_v30, 0.01 }
 0x1cf   : > { %v669_v31 = vsel %vm656_vm13, 0.01, %v628_v30 }
 0x1d0   : > { %v682_v32 = vsel %vm643_vm12, %v1469_v4, %v669_v31 }
 0x1d1   : > { %696 = vst.msk [vmem:[%s1473_s23 + $0x28] sm:$0xff] %vm690_vm3, %v682_v32  ;;  %v602_v33 = vpop.f32.mrf.mxu2 }
 0x1d2   : > { %v603_v34 = vadd.f32 %v1465_v1, %v602_v33 }
 0x1d4   : > { %v629_v35 = vmax.f32 %v603_v34, 0.0 }
 0x1d6   : > { %vm644_vm14 = vcmp.gt.f32.partialorder %v629_v35, %v1469_v4  ;;  %vm657_vm15 = vcmp.lt.f32.partialorder %v629_v35, 0.01 }
 0x1d7   : > { %v670_v36 = vsel %vm657_vm15, 0.01, %v629_v35 }
 0x1d8   : > { %v683_v37 = vsel %vm644_vm14, %v1469_v4, %v670_v36 }
 0x1d9   : > { %697 = vst.msk [vmem:[%s1473_s23 + $0x30] sm:$0xff] %vm690_vm3, %v683_v37  ;;  %v605_v38 = vpop.f32.mrf.mxu2 }
 0x1da   : > { %v606_v39 = vadd.f32 %v1465_v1, %v605_v38 }
 0x1dc   : > { %v630_v40 = vmax.f32 %v606_v39, 0.0 }
 0x1de   : > { %vm645_vm0 = vcmp.gt.f32.partialorder %v630_v40, %v1469_v4  ;;  %vm658_vm1 = vcmp.lt.f32.partialorder %v630_v40, 0.01 }
 0x1df   : > { %v671_v41 = vsel %vm658_vm1, 0.01, %v630_v40 }
 0x1e0   : > { %v684_v42 = vsel %vm645_vm0, %v1469_v4, %v671_v41 }
 0x1e1   : > { %698 = vst.msk [vmem:[%s1473_s23 + $0x38] sm:$0xff] %vm690_vm3, %v684_v42  ;;  %v608_v43 = vpop.f32.mrf.mxu2 }
 0x1e2   : > { %v609_v44 = vadd.f32 %v1465_v1, %v608_v43 }
 0x1e4   : > { %v631_v45 = vmax.f32 %v609_v44, 0.0 }
 0x1e6   : > { %vm646_vm2 = vcmp.gt.f32.partialorder %v631_v45, %v1469_v4  ;;  %vm659_vm4 = vcmp.lt.f32.partialorder %v631_v45, 0.01 }
 0x1e7   : > { %v672_v46 = vsel %vm659_vm4, 0.01, %v631_v45 }
 0x1e8   : > { %v685_v47 = vsel %vm646_vm2, %v1469_v4, %v672_v46 }
 0x1e9   : > { %699 = vst.msk [vmem:[%s1473_s23 + $0x40] sm:$0xff] %vm690_vm3, %v685_v47 }
 0x1ef   : > { %v611_v48 = vpop.f32.mrf.mxu3 }
 0x1f0   : > { %v612_v49 = vadd.f32 %v1465_v1, %v611_v48 }
 0x1f2   : > { %v632_v50 = vmax.f32 %v612_v49, 0.0 }
 0x1f4   : > { %vm647_vm5 = vcmp.gt.f32.partialorder %v632_v50, %v1469_v4  ;;  %vm660_vm6 = vcmp.lt.f32.partialorder %v632_v50, 0.01 }
 0x1f5   : > { %v673_v51 = vsel %vm660_vm6, 0.01, %v632_v50 }
 0x1f6   : > { %v686_v52 = vsel %vm647_vm5, %v1469_v4, %v673_v51 }
 0x1f7   : > { %700 = vst.msk [vmem:[%s1473_s23 + $0x48] sm:$0xff] %vm690_vm3, %v686_v52  ;;  %v614_v53 = vpop.f32.mrf.mxu3 }
 0x1f8   : > { %v615_v54 = vadd.f32 %v1465_v1, %v614_v53 }
 0x1fa   : > { %v633_v55 = vmax.f32 %v615_v54, 0.0 }
 0x1fc   : > { %vm648_vm7 = vcmp.gt.f32.partialorder %v633_v55, %v1469_v4  ;;  %vm661_vm8 = vcmp.lt.f32.partialorder %v633_v55, 0.01 }
 0x1fd   : > { %v674_v56 = vsel %vm661_vm8, 0.01, %v633_v55 }
 0x1fe   : > { %v687_v57 = vsel %vm648_vm7, %v1469_v4, %v674_v56 }
 0x1ff   : > { %701 = vst.msk [vmem:[%s1473_s23 + $0x50] sm:$0xff] %vm690_vm3, %v687_v57  ;;  %v617_v58 = vpop.f32.mrf.mxu3 }
 0x200   : > { %v618_v59 = vadd.f32 %v1465_v1, %v617_v58 }
 0x202   : > { %v634_v60 = vmax.f32 %v618_v59, 0.0 }
 0x204   : > { %vm649_vm9 = vcmp.gt.f32.partialorder %v634_v60, %v1469_v4  ;;  %vm662_vm10 = vcmp.lt.f32.partialorder %v634_v60, 0.01 }
 0x205   : > { %v675_v61 = vsel %vm662_vm10, 0.01, %v634_v60 }
 0x206   : > { %v688_v62 = vsel %vm649_vm9, %v1469_v4, %v675_v61 }
 0x207   : > { %702 = vst.msk [vmem:[%s1473_s23 + $0x58] sm:$0xff] %vm690_vm3, %v688_v62  ;;  %v620_v63 = vpop.f32.mrf.mxu3 }
 0x208   : > { %v621_v0 = vadd.f32 %v1465_v1, %v620_v63 }
 0x20a   : > { %v635_v2 = vmax.f32 %v621_v0, 0.0 }
 0x20b   : > { %710 = sbr.rel (!%p1293_p4) target bundleno = 588 (0x24c), region = 56 }
 0x20c   : > { %vm650_vm11 = vcmp.gt.f32.partialorder %v635_v2, %v1469_v4  ;;  %vm663_vm12 = vcmp.lt.f32.partialorder %v635_v2, 0.01 }
 0x20d   : > { %v676_v3 = vsel %vm663_vm12, 0.01, %v635_v2 }
 0x20e   : > { %v689_v5 = vsel %vm650_vm11, %v1469_v4, %v676_v3 }
 0x20f   : > { %703 = vst.msk [vmem:[%s1473_s23 + $0x60] sm:$0xff] %vm690_vm3, %v689_v5 }
 0x210   : > { %s1649_s29 = smov (!%p713_p8, %s712_s29), 13 }
 0x211   : > { %s988_s9 = sshll.u32 %s1649_s29, 3 }
 0x212   : > { %p991_p9 = scmp.eq.s32.totalorder %s988_s9, 0 }
 0x213   : > { %1126 = sdivrem.u32 (!%p991_p9), %s1649_s29, 13 }
 0x214   : > { %721 = sbr.rel (%p991_p9) target bundleno = 588 (0x24c), region = 60 }
 0x21c   : > { %s1550_s14 = spop.drf %1126 }
 0x21d   : > { %s1128_s11 = spop.drf %1126  ;;  %p992_p10 = scmp.le.s32.totalorder %s1550_s14, 0 }
 0x21e   : > { %s1640_s0 = smov (!%p992_p10), %s1544_s27  ;;  %s1641_s19 = smov (!%p992_p10), %s1473_s23 }
 0x21f   : > { %926 = sbr.rel (%p992_p10) target bundleno = 562 (0x232), region = 136  ;;  %s1559_s12 = smov (!%p992_p10), 0  }
 0x220   : > { %s1561_s15 = smov (!%p992_p10), 0  }
 0x224 LB: >> { %v810_v1 = vld [vmem:[%s1194_s19] sm:$0xff]  ;;  %v812_v4 = vld [vmem:[%s1194_s19 + $0x8] sm:$0xff]  ;;  %v814_v6 = vld [vmem:[%s1194_s19 + $0x10] sm:$0xff]  ;;  %s836_s28 = sadd.s32 1, %s1198_s12  ;;  %s804_s15 = sadd.s32 1, %s1202_s15   ;;  %s1202_s15 = sphi %s1561_s15, %s804_s15   ;;  %s1198_s12 = sphi %s1559_s12, %s1644_s12   ;;  %s1194_s19 = sphi %s1641_s19, %s1643_s19   ;;  %s1190_s0 = sphi %s1640_s0, %s1642_s0  }
 0x225   : >> { %811 = vst [vmem:[%s1190_s0] sm:$0xff] %v810_v1  ;;  %v816_v7 = vld [vmem:[%s1194_s19 + $0x18] sm:$0xff]  ;;  %p837_p11 = scmp.ge.s32.totalorder %s836_s28, %s1550_s14  ;;  %v818_v8 = vld [vmem:[%s1194_s19 + $0x20] sm:$0xff]  ;;  %v820_v9 = vld [vmem:[%s1194_s19 + $0x28] sm:$0xff]  ;;  %p803_p12 = scmp.ge.s32.totalorder %s804_s15, %s1550_s14 }
 0x226   : >> { %813 = vst [vmem:[%s1190_s0 + $0x8] sm:$0xff] %v812_v4  ;;  %v822_v10 = vld [vmem:[%s1194_s19 + $0x30] sm:$0xff]  ;;  %v824_v11 = vld [vmem:[%s1194_s19 + $0x38] sm:$0xff]  ;;  %v826_v12 = vld [vmem:[%s1194_s19 + $0x40] sm:$0xff] }
 0x227   : >> { %815 = vst [vmem:[%s1190_s0 + $0x10] sm:$0xff] %v814_v6  ;;  %s1651_s28 = smov (%p837_p11, %s836_s28), 0  ;;  %v828_v13 = vld [vmem:[%s1194_s19 + $0x48] sm:$0xff]  ;;  %v830_v14 = vld [vmem:[%s1194_s19 + $0x50] sm:$0xff]  ;;  %v832_v15 = vld [vmem:[%s1194_s19 + $0x58] sm:$0xff] }
 0x228   : >> { %817 = vst [vmem:[%s1190_s0 + $0x18] sm:$0xff] %v816_v7  ;;  %s839_s16 = smul.u32 104, %s1651_s28  ;;  %v834_v16 = vld [vmem:[%s1194_s19 + $0x60] sm:$0xff]  ;;  %s1644_s12 = smov %s1651_s28 }
 0x229   : >> { %819 = vst [vmem:[%s1190_s0 + $0x20] sm:$0xff] %v818_v8 }
 0x22a   : >> { %821 = vst [vmem:[%s1190_s0 + $0x28] sm:$0xff] %v820_v9  ;;  %s841_s17 = scalar_lea.vmem %s1473_s23, %s839_s16 [#allocation3]   ;;  %s842_s18 = scalar_lea.vmem %s1544_s27, %s839_s16  }
 0x22b   : >> { %823 = vst [vmem:[%s1190_s0 + $0x30] sm:$0xff] %v822_v10  ;;  %s1643_s19 = smov %s841_s17 }
 0x22c   : >> { %825 = vst [vmem:[%s1190_s0 + $0x38] sm:$0xff] %v824_v11 }
 0x22d   : >> { %827 = vst [vmem:[%s1190_s0 + $0x40] sm:$0xff] %v826_v12  ;;  %806 = sbr.rel (!%p803_p12) target bundleno = 548 (0x224), region = 142 }
 0x22e   : >> { %829 = vst [vmem:[%s1190_s0 + $0x48] sm:$0xff] %v828_v13 }
 0x22f   : >> { %831 = vst [vmem:[%s1190_s0 + $0x50] sm:$0xff] %v830_v14 }
 0x230   : >> { %833 = vst [vmem:[%s1190_s0 + $0x58] sm:$0xff] %v832_v15 }
 0x231   : >> { %835 = vst [vmem:[%s1190_s0 + $0x60] sm:$0xff] %v834_v16  ;;  %s1642_s0 = smov %s842_s18 }
 0x232 PF: > { %1129 = sdivrem.u32 %s1649_s29, 13 }
 0x233   : > { %s993_s20 = smul.u32 104, %s1550_s14 }
 0x235   : > { %s1615_s21 = scalar_lea.vmem %s1473_s23, %s993_s20 [#allocation3]   ;;  %s849_s22 = scalar_lea.vmem %s1544_s27, %s993_s20  }
 0x23b   : > { %s1130_s24 = spop.drf %1129 }
 0x23c   : > { %s1131_s25 = spop.drf %1129 }
 0x23d   : > { %p995_p13 = scmp.le.s32.totalorder %s1131_s25, 0 }
 0x23e   : > { %s1204_s26 = smov (!%p995_p13), %s849_s22   ;;  %s1208_s9 = smov (!%p995_p13), %s1615_s21  }
 0x23f   : > { %940 = sbr.rel (%p995_p13) target bundleno = 588 (0x24c), region = 147  ;;  %s1212_s11 = smov (!%p995_p13), 0  }
 0x240   : > { %s1216_s15 = smov (!%p995_p13), 0  }
 0x244 LB: >> { %v859_v17 = vld [vmem:[%s1210_s9] sm:$0xff]  ;;  %s861_s23 = sadd.s32 1, %s1214_s11  ;;  %s853_s15 = sadd.s32 1, %s1218_s15   ;;  %s1218_s15 = sphi %s1216_s15, %s853_s15   ;;  %s1214_s11 = sphi %s1212_s11, %s1213_s11   ;;  %s1210_s9 = sphi %s1208_s9, %s866_s9   ;;  %s1206_s26 = sphi %s1204_s26, %s867_s26  }
 0x245   : >> { %860 = vst [vmem:[%s1206_s26] sm:$0xff] %v859_v17  ;;  %p862_p0 = scmp.ge.s32.totalorder %s861_s23, %s1131_s25  ;;  %p852_p1 = scmp.ge.s32.totalorder %s853_s15, %s1131_s25 }
 0x247   : >> { %s1653_s23 = smov (%p862_p0, %s861_s23), 0  ;;  %855 = sbr.rel (!%p852_p1) target bundleno = 580 (0x244), region = 153 }
 0x248   : >> { %s996_s29 = sshll.u32 %s1653_s23, 3  ;;  %s1213_s11 = smov %s1653_s23  }
 0x249   : >> { %s866_s9 = scalar_lea.vmem %s1615_s21, %s996_s29 [#allocation3]   ;;  %s867_s26 = scalar_lea.vmem %s849_s22, %s996_s29  }
 0x24c PF: > { %p16_p2 = scmp.ge.s32.totalorder %s1283_s10, 4   ;;  %s1645_s29 = smov %s1182_s30 }
 0x24d   : > { %s1646_s30 = smov %s1291_s13  ;;  %s1647_s9 = smov %s1283_s10 }
 0x24e   :  { %18 = sbr.rel (!%p16_p2) target bundleno = 4 (0x4), region = 164 }

</bundles_post_ra>
